<compile_context>
chip_gen: v5e
topology: v5e:2x2
jax: 0.10.0
libtpu: 0.0.40
codegen_flags: <defaults>
</compile_context>

<pallas_src>
import math

import jax
import jax.numpy as jnp
from jax.experimental import pallas as pl
from jax.experimental.pallas import tpu as pltpu


DROPOUT_P = 0.1
_KEEP_SCALE = 1.0 / (1.0 - DROPOUT_P)
# drop element iff bits < threshold  (P(drop) = threshold / 2^32 ~= 0.1)
_DROP_THRESHOLD = int(DROPOUT_P * (1 << 32))

# Tile budget: ~2 MiB of f32 per operand tile keeps the double-buffered
# footprint (x, bits, out, pe) well under the scoped-VMEM default on every
# generation (v5e 16 MiB default, v6e/v7x 32 MiB default, v7x 64 MiB physical).
_MAX_TILE_ELEMS = 512 * 1024        # 2 MiB in f32
_LANE_TILE_CAP = 128 * 1024         # multiple of 128; 512 KiB per f32 row


def _build_pe(max_len: int, d_model: int) -> jnp.ndarray:
    """Deterministic sinusoidal table, identical to the PyTorch __init__."""
    position = jnp.arange(max_len, dtype=jnp.float32)[:, None]           # (L, 1)
    div_term = jnp.exp(jnp.arange(0, d_model, 2, dtype=jnp.float32)
                       * (-math.log(10000.0) / d_model))                  # (D/2,)
    pe = jnp.zeros((max_len, d_model), dtype=jnp.float32)
    pe = pe.at[:, 0::2].set(jnp.sin(position * div_term))
    pe = pe.at[:, 1::2].set(jnp.cos(position * div_term))
    return pe                                                             # (L, D)


def _choose_tiles(B: int, L: int):
    """Pick (row_tile, lane_tile) that are TPU-layout legal and VMEM-bounded."""
    if B * L <= _MAX_TILE_ELEMS:
        return B, L                                   # whole problem in one tile
    # lane tile: full L (always legal) or a multiple of 128
    tl = L if L <= _LANE_TILE_CAP else _LANE_TILE_CAP
    rows = max(1, _MAX_TILE_ELEMS // tl)
    if B <= rows:
        tb = B                                        # full dim -> legal
    elif rows >= 8:
        tb = (rows // 8) * 8                          # multiple of 8 -> legal
    elif B <= 8:
        tb = B                                        # full dim -> legal (small overshoot)
    else:
        tb = 8                                        # multiple of 8 -> legal
    return tb, tl


def _add_pe_kernel(x_ref, pe_ref, o_ref):
    # x_ref: (TB, TL), pe_ref: (1, TL) broadcast over rows, o_ref: (TB, TL)
    o_ref[...] = (x_ref[...] + pe_ref[...]).astype(o_ref.dtype)


def _add_pe_dropout_kernel(x_ref, pe_ref, bits_ref, o_ref):
    y = x_ref[...] + pe_ref[...]
    # Inverted dropout via integer threshold on raw uint32 random bits.
    keep = bits_ref[...] >= jnp.uint32(_DROP_THRESHOLD)
    o_ref[...] = jnp.where(keep, y * _KEEP_SCALE, 0.0).astype(o_ref.dtype)


def positional_encoding_forward(x, pe_table, *, dropout_key=None, training=False):
    """x: (B, S, D). pe_table: (max_len, D). Returns (B, S, D)."""
    B, S, D = x.shape
    L = S * D

    # Lane-dense 2D view: batch rows on the sublane axis, S*D on the lane axis.
    x2 = x.reshape(B, L)
    pe2 = pe_table[:S].reshape(1, L).astype(x.dtype)   # broadcast over batch in-kernel

    tb, tl = _choose_tiles(B, L)
    grid = (pl.cdiv(B, tb), pl.cdiv(L, tl))

    x_spec = pl.BlockSpec((tb, tl), lambda b, l: (b, l))
    pe_spec = pl.BlockSpec((1, tl), lambda b, l: (0, l))
    out_spec = pl.BlockSpec((tb, tl), lambda b, l: (b, l))

    cparams = pltpu.CompilerParams(
        dimension_semantics=("parallel", "parallel"),   # independent rows & lanes
        vmem_limit_bytes=32 * 1024 * 1024,
    )

    if training:
        # TODO(synk): PyTorch's dropout RNG stream cannot be reproduced
        # bit-exactly; keep probability (0.9) and 1/0.9 scaling match.
        if dropout_key is None:
            dropout_key = jax.random.PRNGKey(0)
        bits = jax.random.bits(dropout_key, (B, L), dtype=jnp.uint32)
        out2 = pl.pallas_call(
            _add_pe_dropout_kernel,
            out_shape=jax.ShapeDtypeStruct((B, L), x.dtype),
            grid=grid,
            in_specs=[x_spec, pe_spec, pl.BlockSpec((tb, tl), lambda b, l: (b, l))],
            out_specs=out_spec,
            compiler_params=cparams,
        )(x2, pe2, bits)
    else:
        out2 = pl.pallas_call(
            _add_pe_kernel,
            out_shape=jax.ShapeDtypeStruct((B, L), x.dtype),
            grid=grid,
            in_specs=[x_spec, pe_spec],
            out_specs=out_spec,
            compiler_params=cparams,
        )(x2, pe2)

    return out2.reshape(B, S, D)


if __name__ == "__main__":
    key = jax.random.PRNGKey(0)
    B, S, D = 2, 8, 32
    max_len = 1000

    x = jax.random.normal(key, (B, S, D), dtype=jnp.float32)
    pe_table = _build_pe(max_len, D)

    # Eval mode (dropout is identity): must match x + pe exactly.
    y_eval = jax.block_until_ready(
        positional_encoding_forward(x, pe_table, training=False))
    ref_eval = x + pe_table[:S][None, :, :]
    assert y_eval.shape == (B, S, D)
    assert jnp.allclose(y_eval, ref_eval, atol=1e-6), "eval-mode mismatch"

    # Training mode: reproduce the exact same mask host-side and compare.
    dkey = jax.random.PRNGKey(1234)
    y_train = jax.block_until_ready(
        positional_encoding_forward(x, pe_table, dropout_key=dkey, training=True))
    bits_ref = jax.random.bits(dkey, (B, S * D), dtype=jnp.uint32).reshape(B, S, D)
    keep_ref = bits_ref >= jnp.uint32(_DROP_THRESHOLD)
    ref_train = jnp.where(keep_ref, ref_eval * _KEEP_SCALE, 0.0)
    assert y_train.shape == (B, S, D)
    assert jnp.allclose(y_train, ref_train, atol=1e-6), "train-mode mismatch"

    print("KERNEL_OK")
</pallas_src>

<mosaic_0001>
module attributes {stable_mosaic.version = 11 : i64} {
  func.func @_add_pe_kernel(%arg0: i32, %arg1: i32, %arg2: memref<2x256xf32, #tpu.memory_space<vmem>>, %arg3: memref<1x256xf32, #tpu.memory_space<vmem>>, %arg4: memref<2x256xf32, #tpu.memory_space<vmem>>) attributes {dimension_semantics = [#tpu.dimension_semantics<parallel>, #tpu.dimension_semantics<parallel>], iteration_bounds = array<i64: 1, 1>, scalar_prefetch = 0 : i64, scratch_operands = 0 : i64, tpu.core_type = #tpu.core_type<tc>, window_params = [{transform_indices = @transform_0, window_bounds = array<i64: 2, 256>}, {transform_indices = @transform_1, window_bounds = array<i64: 1, 256>}, {transform_indices = @transform_2, window_bounds = array<i64: 2, 256>}]} {
    %c0 = arith.constant 0 : index
    %c0_0 = arith.constant 0 : index
    %0 = vector.load %arg2[%c0, %c0_0] : memref<2x256xf32, #tpu.memory_space<vmem>>, vector<2x256xf32>
    %c0_1 = arith.constant 0 : index
    %c0_2 = arith.constant 0 : index
    %1 = vector.load %arg3[%c0_1, %c0_2] : memref<1x256xf32, #tpu.memory_space<vmem>>, vector<1x256xf32>
    %2 = vector.broadcast %1 : vector<1x256xf32> to vector<2x256xf32>
    %3 = arith.addf %0, %2 : vector<2x256xf32>
    %c0_3 = arith.constant 0 : index
    %c0_4 = arith.constant 0 : index
    %4 = vector.load %arg4[%c0_3, %c0_4] : memref<2x256xf32, #tpu.memory_space<vmem>>, vector<2x256xf32>
    tpu.vector_store %arg4[%c0_3, %c0_4], %3 {strides = array<i32>} : memref<2x256xf32, #tpu.memory_space<vmem>>, vector<2x256xf32>,
    return
  }
  func.func @transform_0(%arg0: i32, %arg1: i32) -> (i32, i32) {
    %c0_i32 = arith.constant 0 : i32
    return %arg0, %arg1 : i32, i32
  }
  func.func @transform_1(%arg0: i32, %arg1: i32) -> (i32, i32) {
    %c0_i32 = arith.constant 0 : i32
    %c0_i32_0 = arith.constant 0 : i32
    return %c0_i32, %arg1 : i32, i32
  }
  func.func @transform_2(%arg0: i32, %arg1: i32) -> (i32, i32) {
    %c0_i32 = arith.constant 0 : i32
    return %arg0, %arg1 : i32, i32
  }
}

</mosaic_0001>

<bundles_post_ra>
// kernel: tpu_custom_call.1
= control target key start
LH: loop header
LB: loop body
LE: loop exit
PB: predicated region body
PF: predicated region fallthrough
CT: control target
= control target key end

     0   :  { %7 = vsyncpa [#allocation3], 0  ;;  %s177_s0 = inlined_call_operand.hbm [shape: f32[2,256], index: 0, kind: input, shape index: {}]   ;;  %s178_s1 = inlined_call_operand.hbm [shape: f32[1,256], index: 1, kind: input, shape index: {}]   ;;  %s179_s2 = inlined_call_operand.hbm [shape: f32[2,256], index: 2, kind: output, shape index: {}]  }
   0x1   :  { %8 = vsyncpa [#allocation6], 0 }
   0x2   :  { %9 = vsyncpa [#allocation4], 0  ;;  %s15_s11 = sshll.u32 %s177_s0, 4  ;;  %s150_s12 = smov [#allocation2]   ;;  %s16_s11 = int_to_ptr.hbm [resolvable:$true] %s15_s11 }
   0x3   :  { %s17_s13 = sshll.u32 %s150_s12, 4  ;;  %s26_s16 = sshll.u32 %s178_s1, 4  ;;  %s18_s13 = int_to_ptr.vmem [resolvable:$true] %s17_s13  ;;  %s27_s16 = int_to_ptr.hbm [resolvable:$true] %s26_s16 }
   0x4   :  { %20 = dma.hbm_to_vmem [thread:$0]  %s16_s11, 64, %s18_s13, [#allocation3]  }
   0x5   :  { %s151_s17 = smov [#allocation5]  }
   0x6   :  { %s28_s18 = sshll.u32 %s151_s17, 4  ;;  %s29_s18 = int_to_ptr.vmem [resolvable:$true] %s28_s18 }
   0x7   :  { %31 = dma.hbm_to_vmem [thread:$0]  %s27_s16, 32, %s29_s18, [#allocation6]  }
   0x8   :  { %144 = dma.done.wait [#allocation3], 64  }
   0x9   :  { %145 = vsyncadd [#allocation3], 4294967232 }
   0xa   :  { %146 = dma.done.wait [#allocation6], 32  }
   0xb   :  { %147 = vsyncadd [#allocation6], 4294967264  ;;  %v41_v0 = vld [vmem:[#allocation5] sm:$0x3]  ;;  %vm46_vm0 = vcmask 1041408   ;;  %s152_s0 = smov [#allocation7]  }
   0xc   :  { %v43_v1 = vperm.slane %v41_v0, 0  ;;  %v44_v2 = vperm.slane %v41_v0, 1  ;;  %v40_v3 = vld [vmem:[#allocation2] sm:$0xf]  ;;  %s56_s19 = sshll.u32 %s152_s0, 4  ;;  %s58_s21 = sshll.u32 %s179_s2, 4  ;;  %s57_s19 = int_to_ptr.vmem [resolvable:$true] %s56_s19  ;;  %s59_s21 = int_to_ptr.hbm [resolvable:$true] %s58_s21 }
   0xe   :  { %v45_v4 = vrot.slane %v44_v2, 6 }
  0x10   :  { %v47_v5 = vsel %vm46_vm0, %v43_v1, %v45_v4 }
  0x11   :  { %v49_v6 = vadd.f32 %v47_v5, %v40_v3 }
  0x13   :  { %50 = vst [vmem:[#allocation7] sm:$0xf] %v49_v6 }
  0x14   :  { %61 = dma.vmem_to_hbm [thread:$0]  %s57_s19, 64, %s59_s21, [#allocation4]  }
  0x15   :  { %148 = dma.done.wait [#allocation4], 64  }
  0x16   :  { %149 = vsyncadd [#allocation4], 4294967232 }
  0x17   :  { %66 = vsyncpa [#allocation3], 1 }
  0x18   :  { %67 = vsyncpa [#allocation6], 1 }
  0x19   :  { %68 = vsyncpa [#allocation4], 1 }

</bundles_post_ra>
